<compile_context>
chip_gen: v7x
topology: tpu7x:2x2x1
jax: 0.10.0
libtpu: 0.0.40
codegen_flags: <defaults>
</compile_context>

<pallas_src>
import jax
import jax.numpy as jnp
from jax.experimental import pallas as pl
from jax.experimental.pallas import tpu as pltpu


def cross_entropy_discriminator(query_emb, pos_emb, neg_emb, weight, bias,
                                *, tile_rows=None):
    """Pallas implementation of CrossEntropyDiscriminator.forward.

    query_emb, pos_emb, neg_emb: (B, H) embeddings (f32 or bf16).
    weight: (H, 2), bias: (2,) — the model's binary classification head.
    Returns the scalar mean cross-entropy loss (float32).
    """
    B, H = query_emb.shape
    assert pos_emb.shape == (B, H) and neg_emb.shape == (B, H)
    assert weight.shape[1] == 2, "binary discriminator head expected"

    # 2-class cross entropy only ever sees the logit difference, so only the
    # weight/bias deltas need to travel to the chip.
    w_delta = (weight[:, 1] - weight[:, 0]).astype(jnp.float32).reshape(1, H)
    b_delta = (bias[1] - bias[0]).astype(jnp.float32).reshape(1, 1)

    itemsize = jnp.dtype(query_emb.dtype).itemsize

    # Row tile: biggest tile whose double-buffered 3-input working set stays
    # ~24 MiB (fits the scoped VMEM limit on v5e/v6e and physical VMEM on v7x).
    if tile_rows is None:
        budget = 24 * 1024 * 1024
        tm = budget // (2 * 3 * H * itemsize)
        tm = max(8, (tm // 8) * 8)
        tm = min(tm, 1024)
    else:
        tm = int(tile_rows)
    if B <= tm:
        tm = B                      # single full-extent block is always legal
    grid = (pl.cdiv(B, tm),)
    n_total = 3 * B                 # divide by the true row count, not padded

    working = 2 * 3 * tm * H * itemsize + 2 * H * 4 + (1 << 14)
    vmem_limit = int(min(48 * 1024 * 1024,
                         max(32 * 1024 * 1024, working + (8 << 20))))

    def kernel(q_ref, p_ref, n_ref, wd_ref, bd_ref, out_ref, acc_ref):
        i = pl.program_id(0)

        @pl.when(i == 0)
        def _():
            acc_ref[...] = jnp.zeros_like(acc_ref)

        wd = wd_ref[...]                   # (1, H) f32, resident across steps
        bd = bd_ref[0, 0]                  # scalar f32 from SMEM

        def logit_delta(ref):
            # lane-dense VPU multiply + XLU lane reduction; native-dtype DMA,
            # f32 math in-register.
            x = ref[...].astype(jnp.float32)                       # (tm, H)
            return jnp.sum(x * wd, axis=-1, keepdims=True) + bd    # (tm, 1)

        def softplus(z):
            # numerically-stable softplus == -log p(target) for C == 2
            return jnp.maximum(z, 0.0) + jnp.log(1.0 + jnp.exp(-jnp.abs(z)))

        per_row = (softplus(logit_delta(q_ref))       # query rows: target 0
                   + softplus(-logit_delta(p_ref))    # pos rows:   target 1
                   + softplus(-logit_delta(n_ref)))   # neg rows:   target 1

        # Mask padded rows of the ragged last tile.
        rows = jax.lax.broadcasted_iota(jnp.int32, per_row.shape, 0)
        valid = rows < (B - i * tm)
        acc_ref[...] += jnp.sum(jnp.where(valid, per_row, 0.0),
                                axis=0, keepdims=True)

        @pl.when(i == pl.num_programs(0) - 1)
        def _():
            out_ref[...] = acc_ref[...] * (1.0 / float(n_total))

    out = pl.pallas_call(
        kernel,
        out_shape=jax.ShapeDtypeStruct((1, 1), jnp.float32),
        grid_spec=pltpu.PrefetchScalarGridSpec(
            num_scalar_prefetch=0,
            grid=grid,
            in_specs=[
                pl.BlockSpec((tm, H), lambda i: (i, 0)),   # query tile
                pl.BlockSpec((tm, H), lambda i: (i, 0)),   # pos tile
                pl.BlockSpec((tm, H), lambda i: (i, 0)),   # neg tile
                pl.BlockSpec((1, H), lambda i: (0, 0)),    # w_delta (resident)
                pl.BlockSpec(memory_space=pltpu.MemorySpace.SMEM),  # b_delta
            ],
            out_specs=pl.BlockSpec((1, 1), lambda i: (0, 0)),
            scratch_shapes=[pltpu.VMEM((1, 1), jnp.float32)],
        ),
        compiler_params=pltpu.CompilerParams(
            dimension_semantics=("arbitrary",),   # reduction over row tiles
            vmem_limit_bytes=vmem_limit,
        ),
    )(query_emb, pos_emb, neg_emb, w_delta, b_delta)
    return out[0, 0]


def _reference_loss(query_emb, pos_emb, neg_emb, weight, bias):
    """Pure-JAX reference matching torch.nn.CrossEntropyLoss semantics."""
    B = query_emb.shape[0]
    x = jnp.concatenate([query_emb, pos_emb, neg_emb], axis=0).astype(jnp.float32)
    logits = jnp.dot(x, weight.astype(jnp.float32),
                     precision=jax.lax.Precision.HIGHEST) + bias.astype(jnp.float32)
    targets = jnp.concatenate(
        [jnp.zeros((B,), dtype=jnp.int32), jnp.ones((2 * B,), dtype=jnp.int32)]
    )
    logp = jax.nn.log_softmax(logits, axis=-1)
    return -jnp.mean(jnp.take_along_axis(logp, targets[:, None], axis=1))


if __name__ == "__main__":
    key = jax.random.PRNGKey(0)

    # --- Test 1: small f32 case, single tile --------------------------------
    B, H, C = 8, 32, 2
    kq, kp, kn, kw, kb = jax.random.split(key, 5)
    query_emb = jax.random.normal(kq, (B, H), dtype=jnp.float32)
    pos_emb = jax.random.normal(kp, (B, H), dtype=jnp.float32)
    neg_emb = jax.random.normal(kn, (B, H), dtype=jnp.float32)
    weight = jax.random.normal(kw, (H, C), dtype=jnp.float32) * 0.1
    bias = jax.random.normal(kb, (C,), dtype=jnp.float32) * 0.1

    loss = cross_entropy_discriminator(query_emb, pos_emb, neg_emb, weight, bias)
    loss = jax.block_until_ready(loss)
    ref = _reference_loss(query_emb, pos_emb, neg_emb, weight, bias)
    assert jnp.allclose(loss, ref, rtol=1e-5, atol=1e-5), (loss, ref)

    # --- Test 2: gridded + ragged last tile (B not a multiple of the tile) --
    B2, H2 = 20, 32
    k1, k2, k3, k4, k5 = jax.random.split(jax.random.PRNGKey(1), 5)
    q2 = jax.random.normal(k1, (B2, H2), dtype=jnp.float32)
    p2 = jax.random.normal(k2, (B2, H2), dtype=jnp.float32)
    n2 = jax.random.normal(k3, (B2, H2), dtype=jnp.float32)
    w2 = jax.random.normal(k4, (H2, 2), dtype=jnp.float32) * 0.1
    b2 = jax.random.normal(k5, (2,), dtype=jnp.float32) * 0.1
    loss2 = jax.block_until_ready(
        cross_entropy_discriminator(q2, p2, n2, w2, b2, tile_rows=8))
    ref2 = _reference_loss(q2, p2, n2, w2, b2)
    assert jnp.allclose(loss2, ref2, rtol=1e-5, atol=1e-5), (loss2, ref2)

    # --- Test 3: bf16 embeddings (native-dtype DMA, f32 math in-kernel) -----
    B3, H3 = 24, 128
    k1, k2, k3, k4, k5 = jax.random.split(jax.random.PRNGKey(2), 5)
    q3 = jax.random.normal(k1, (B3, H3), dtype=jnp.bfloat16)
    p3 = jax.random.normal(k2, (B3, H3), dtype=jnp.bfloat16)
    n3 = jax.random.normal(k3, (B3, H3), dtype=jnp.bfloat16)
    w3 = jax.random.normal(k4, (H3, 2), dtype=jnp.float32) * 0.1
    b3 = jax.random.normal(k5, (2,), dtype=jnp.float32) * 0.1
    loss3 = jax.block_until_ready(
        cross_entropy_discriminator(q3, p3, n3, w3, b3, tile_rows=8))
    ref3 = _reference_loss(q3.astype(jnp.float32), p3.astype(jnp.float32),
                           n3.astype(jnp.float32), w3, b3)
    assert jnp.allclose(loss3, ref3, rtol=1e-3, atol=1e-3), (loss3, ref3)

    print("KERNEL_OK")
</pallas_src>

<mosaic_0001>
module attributes {stable_mosaic.version = 11 : i64} {
  func.func @kernel(%arg0: i32, %arg1: memref<8x32xf32, #tpu.memory_space<vmem>>, %arg2: memref<8x32xf32, #tpu.memory_space<vmem>>, %arg3: memref<8x32xf32, #tpu.memory_space<vmem>>, %arg4: memref<1x32xf32, #tpu.memory_space<vmem>>, %arg5: memref<1x1xf32, #tpu.memory_space<smem>>, %arg6: memref<1x1xf32, #tpu.memory_space<vmem>>, %arg7: memref<1x1xf32, #tpu.memory_space<vmem>>) attributes {dimension_semantics = [#tpu.dimension_semantics<arbitrary>], iteration_bounds = array<i64: 1>, scalar_prefetch = 0 : i64, scratch_operands = 1 : i64, tpu.core_type = #tpu.core_type<tc>, window_params = [{transform_indices = @transform_0, window_bounds = array<i64: 8, 32>}, {transform_indices = @transform_1, window_bounds = array<i64: 8, 32>}, {transform_indices = @transform_2, window_bounds = array<i64: 8, 32>}, {pipeline_mode = #tpu.pipeline_mode<synchronous>, transform_indices = @transform_3, window_bounds = array<i64: 1, 32>}, {transform_indices = @transform_4, window_bounds = array<i64: 1, 1>}, {pipeline_mode = #tpu.pipeline_mode<synchronous>, transform_indices = @transform_5, window_bounds = array<i64: 1, 1>}]} {
    %c0_i32 = arith.constant 0 : i32
    %0 = arith.cmpi eq, %arg0, %c0_i32 : i32
    %1 = arith.extui %0 : i1 to i32
    %c0_i32_0 = arith.constant 0 : i32
    %2 = arith.cmpi ne, %1, %c0_i32_0 : i32
    scf.if %2 {
      %cst_32 = arith.constant 0.000000e+00 : f32
      %77 = vector.broadcast %cst_32 : f32 to vector<1x1xf32>
      %c0_33 = arith.constant 0 : index
      %c0_34 = arith.constant 0 : index
      %78 = vector.load %arg7[%c0_33, %c0_34] : memref<1x1xf32, #tpu.memory_space<vmem>>, vector<1x1xf32>
      tpu.vector_store %arg7[%c0_33, %c0_34], %77 {strides = array<i32>} : memref<1x1xf32, #tpu.memory_space<vmem>>, vector<1x1xf32>,
    } else {
    }
    %c0 = arith.constant 0 : index
    %c0_1 = arith.constant 0 : index
    %3 = vector.load %arg4[%c0, %c0_1] : memref<1x32xf32, #tpu.memory_space<vmem>>, vector<1x32xf32>
    %c0_2 = arith.constant 0 : index
    %c0_3 = arith.constant 0 : index
    %4 = memref.load %arg5[%c0_2, %c0_3] : memref<1x1xf32, #tpu.memory_space<smem>>
    %c0_4 = arith.constant 0 : index
    %c0_5 = arith.constant 0 : index
    %5 = vector.load %arg1[%c0_4, %c0_5] : memref<8x32xf32, #tpu.memory_space<vmem>>, vector<8x32xf32>
    %6 = vector.broadcast %3 : vector<1x32xf32> to vector<8x32xf32>
    %7 = arith.mulf %5, %6 : vector<8x32xf32>
    %cst = arith.constant dense<0.000000e+00> : vector<8xf32>
    %8 = vector.multi_reduction <add>, %7, %cst [1] : vector<8x32xf32> to vector<8xf32>
    %9 = vector.shape_cast %8 : vector<8xf32> to vector<8x1xf32>
    %10 = vector.broadcast %4 : f32 to vector<8x1xf32>
    %11 = arith.addf %9, %10 : vector<8x1xf32>
    %cst_6 = arith.constant 0.000000e+00 : f32
    %12 = vector.broadcast %cst_6 : f32 to vector<8x1xf32>
    %13 = arith.maximumf %11, %12 : vector<8x1xf32>
    %14 = math.absf %11 : vector<8x1xf32>
    %cst_7 = arith.constant 0.000000e+00 : f32
    %15 = vector.broadcast %cst_7 : f32 to vector<8x1xf32>
    %16 = arith.subf %15, %14 : vector<8x1xf32>
    %17 = math.exp %16 : vector<8x1xf32>
    %cst_8 = arith.constant 1.000000e+00 : f32
    %18 = vector.broadcast %cst_8 : f32 to vector<8x1xf32>
    %19 = arith.addf %18, %17 : vector<8x1xf32>
    %20 = math.log %19 : vector<8x1xf32>
    %21 = arith.addf %13, %20 : vector<8x1xf32>
    %c0_9 = arith.constant 0 : index
    %c0_10 = arith.constant 0 : index
    %22 = vector.load %arg2[%c0_9, %c0_10] : memref<8x32xf32, #tpu.memory_space<vmem>>, vector<8x32xf32>
    %23 = vector.broadcast %3 : vector<1x32xf32> to vector<8x32xf32>
    %24 = arith.mulf %22, %23 : vector<8x32xf32>
    %cst_11 = arith.constant dense<0.000000e+00> : vector<8xf32>
    %25 = vector.multi_reduction <add>, %24, %cst_11 [1] : vector<8x32xf32> to vector<8xf32>
    %26 = vector.shape_cast %25 : vector<8xf32> to vector<8x1xf32>
    %27 = vector.broadcast %4 : f32 to vector<8x1xf32>
    %28 = arith.addf %26, %27 : vector<8x1xf32>
    %cst_12 = arith.constant 0.000000e+00 : f32
    %29 = vector.broadcast %cst_12 : f32 to vector<8x1xf32>
    %30 = arith.subf %29, %28 : vector<8x1xf32>
    %cst_13 = arith.constant 0.000000e+00 : f32
    %31 = vector.broadcast %cst_13 : f32 to vector<8x1xf32>
    %32 = arith.maximumf %30, %31 : vector<8x1xf32>
    %33 = math.absf %30 : vector<8x1xf32>
    %cst_14 = arith.constant 0.000000e+00 : f32
    %34 = vector.broadcast %cst_14 : f32 to vector<8x1xf32>
    %35 = arith.subf %34, %33 : vector<8x1xf32>
    %36 = math.exp %35 : vector<8x1xf32>
    %cst_15 = arith.constant 1.000000e+00 : f32
    %37 = vector.broadcast %cst_15 : f32 to vector<8x1xf32>
    %38 = arith.addf %37, %36 : vector<8x1xf32>
    %39 = math.log %38 : vector<8x1xf32>
    %40 = arith.addf %32, %39 : vector<8x1xf32>
    %41 = arith.addf %21, %40 : vector<8x1xf32>
    %c0_16 = arith.constant 0 : index
    %c0_17 = arith.constant 0 : index
    %42 = vector.load %arg3[%c0_16, %c0_17] : memref<8x32xf32, #tpu.memory_space<vmem>>, vector<8x32xf32>
    %43 = vector.broadcast %3 : vector<1x32xf32> to vector<8x32xf32>
    %44 = arith.mulf %42, %43 : vector<8x32xf32>
    %cst_18 = arith.constant dense<0.000000e+00> : vector<8xf32>
    %45 = vector.multi_reduction <add>, %44, %cst_18 [1] : vector<8x32xf32> to vector<8xf32>
    %46 = vector.shape_cast %45 : vector<8xf32> to vector<8x1xf32>
    %47 = vector.broadcast %4 : f32 to vector<8x1xf32>
    %48 = arith.addf %46, %47 : vector<8x1xf32>
    %cst_19 = arith.constant 0.000000e+00 : f32
    %49 = vector.broadcast %cst_19 : f32 to vector<8x1xf32>
    %50 = arith.subf %49, %48 : vector<8x1xf32>
    %cst_20 = arith.constant 0.000000e+00 : f32
    %51 = vector.broadcast %cst_20 : f32 to vector<8x1xf32>
    %52 = arith.maximumf %50, %51 : vector<8x1xf32>
    %53 = math.absf %50 : vector<8x1xf32>
    %cst_21 = arith.constant 0.000000e+00 : f32
    %54 = vector.broadcast %cst_21 : f32 to vector<8x1xf32>
    %55 = arith.subf %54, %53 : vector<8x1xf32>
    %56 = math.exp %55 : vector<8x1xf32>
    %cst_22 = arith.constant 1.000000e+00 : f32
    %57 = vector.broadcast %cst_22 : f32 to vector<8x1xf32>
    %58 = arith.addf %57, %56 : vector<8x1xf32>
    %59 = math.log %58 : vector<8x1xf32>
    %60 = arith.addf %52, %59 : vector<8x1xf32>
    %61 = arith.addf %41, %60 : vector<8x1xf32>
    %62 = tpu.iota {dimensions = array<i32: 0>} : vector<8x1xi32>
    %c8_i32 = arith.constant 8 : i32
    %63 = arith.muli %arg0, %c8_i32 : i32
    %c8_i32_23 = arith.constant 8 : i32
    %64 = arith.subi %c8_i32_23, %63 : i32
    %65 = vector.broadcast %64 : i32 to vector<8x1xi32>
    %66 = arith.cmpi slt, %62, %65 : vector<8x1xi32>
    %c0_24 = arith.constant 0 : index
    %c0_25 = arith.constant 0 : index
    %67 = vector.load %arg7[%c0_24, %c0_25] : memref<1x1xf32, #tpu.memory_space<vmem>>, vector<1x1xf32>
    %cst_26 = arith.constant 0.000000e+00 : f32
    %68 = vector.broadcast %cst_26 : f32 to vector<8x1xf32>
    %69 = arith.select %66, %61, %68 : vector<8x1xi1>, vector<8x1xf32>
    %cst_27 = arith.constant dense<0.000000e+00> : vector<1xf32>
    %70 = vector.multi_reduction <add>, %69, %cst_27 [0] : vector<8x1xf32> to vector<1xf32>
    %71 = vector.shape_cast %70 : vector<1xf32> to vector<1x1xf32>
    %72 = arith.addf %67, %71 : vector<1x1xf32>
    %c0_28 = arith.constant 0 : index
    %c0_29 = arith.constant 0 : index
    %73 = vector.load %arg7[%c0_28, %c0_29] : memref<1x1xf32, #tpu.memory_space<vmem>>, vector<1x1xf32>
    tpu.vector_store %arg7[%c0_28, %c0_29], %72 {strides = array<i32>} : memref<1x1xf32, #tpu.memory_space<vmem>>, vector<1x1xf32>,
    %c0_i32_30 = arith.constant 0 : i32
    %74 = arith.cmpi eq, %arg0, %c0_i32_30 : i32
    %75 = arith.extui %74 : i1 to i32
    %c0_i32_31 = arith.constant 0 : i32
    %76 = arith.cmpi ne, %75, %c0_i32_31 : i32
    scf.if %76 {
      %c0_32 = arith.constant 0 : index
      %c0_33 = arith.constant 0 : index
      %77 = vector.load %arg7[%c0_32, %c0_33] : memref<1x1xf32, #tpu.memory_space<vmem>>, vector<1x1xf32>
      %cst_34 = arith.constant 0.0416666679 : f32
      %78 = vector.broadcast %cst_34 : f32 to vector<1x1xf32>
      %79 = arith.mulf %77, %78 : vector<1x1xf32>
      %c0_35 = arith.constant 0 : index
      %c0_36 = arith.constant 0 : index
      %80 = vector.load %arg6[%c0_35, %c0_36] : memref<1x1xf32, #tpu.memory_space<vmem>>, vector<1x1xf32>
      tpu.vector_store %arg6[%c0_35, %c0_36], %79 {strides = array<i32>} : memref<1x1xf32, #tpu.memory_space<vmem>>, vector<1x1xf32>,
    } else {
    }
    return
  }
  func.func @transform_0(%arg0: i32) -> (i32, i32) {
    %c0_i32 = arith.constant 0 : i32
    %c0_i32_0 = arith.constant 0 : i32
    return %arg0, %c0_i32 : i32, i32
  }
  func.func @transform_1(%arg0: i32) -> (i32, i32) {
    %c0_i32 = arith.constant 0 : i32
    %c0_i32_0 = arith.constant 0 : i32
    return %arg0, %c0_i32 : i32, i32
  }
  func.func @transform_2(%arg0: i32) -> (i32, i32) {
    %c0_i32 = arith.constant 0 : i32
    %c0_i32_0 = arith.constant 0 : i32
    return %arg0, %c0_i32 : i32, i32
  }
  func.func @transform_3(%arg0: i32) -> (i32, i32) {
    %c0_i32 = arith.constant 0 : i32
    %c0_i32_0 = arith.constant 0 : i32
    %c0_i32_1 = arith.constant 0 : i32
    return %c0_i32, %c0_i32_0 : i32, i32
  }
  func.func @transform_4(%arg0: i32) -> (i32, i32) {
    %c0_i32 = arith.constant 0 : i32
    %c0_i32_0 = arith.constant 0 : i32
    %c0_i32_1 = arith.constant 0 : i32
    return %c0_i32, %c0_i32_0 : i32, i32
  }
  func.func @transform_5(%arg0: i32) -> (i32, i32) {
    %c0_i32 = arith.constant 0 : i32
    %c0_i32_0 = arith.constant 0 : i32
    %c0_i32_1 = arith.constant 0 : i32
    return %c0_i32, %c0_i32_0 : i32, i32
  }
}

</mosaic_0001>

<bundles_post_ra>
// kernel: tpu_custom_call.1
= control target key start
LH: loop header
LB: loop body
LE: loop exit
PB: predicated region body
PF: predicated region fallthrough
CT: control target
= control target key end

     0   :  { %11 = vsyncpa [#allocation5], 0  ;;  %s321_s0 = inlined_call_operand.hbm [shape: f32[8,32], index: 0, kind: input, shape index: {}]   ;;  %s322_s1 = inlined_call_operand.hbm [shape: f32[8,32], index: 1, kind: input, shape index: {}]   ;;  %s323_s2 = inlined_call_operand.vmem [shape: f32[8,32], index: 2, kind: input, shape index: {}]   ;;  %s324_s3 = inlined_call_operand.vmem [shape: f32[1,32], index: 3, kind: input, shape index: {}]   ;;  %s325_s4 = inlined_call_operand.<no memory space> [shape: f32[1,1], index: 4, kind: input, shape index: {}]   ;;  %s326_s5 = inlined_call_operand.hbm [shape: f32[1,1], index: 5, kind: output, shape index: {}]  }
   0x1   :  { %12 = vsyncpa [#allocation8], 0 }
   0x2   :  { %13 = vsyncpa [#allocation6], 0  ;;  %s239_s18 = smov [#allocation4]   ;;  %s240_s20 = smov [#allocation7]  }
   0x3   :  { %s20_s19 = sshll.u32 %s239_s18, 4  ;;  %s30_s21 = sshll.u32 %s240_s20, 4  ;;  %s21_s19 = int_to_ptr.vmem [resolvable:$true] %s20_s19  ;;  %s31_s21 = int_to_ptr.vmem [resolvable:$true] %s30_s21 }
   0x4   :  { %s167_s24 = scalar_lea.hbm %s321_s0, 128 }
   0x5   :  { %p168_p0 = scmp.ne.s32.totalorder %s321_s0, %s167_s24  ;;  %p171_p1 = scmp.lt.u32.totalorder %s167_s24, %s321_s0 }
   0x7   :  { %p173_p2 = pnand %p171_p1, %p168_p0 }
   0x9   :  { %176 = shalt.err (!%p173_p2)
}
   0xa   :  { %s177_s29 = scalar_lea.vmem %s21_s19, 128  ;;  %p182_p4 = scmp.lt.s32.totalorder %s21_s19, %s21_s19 }
   0xb   :  { %p178_p3 = scmp.ne.s32.totalorder %s21_s19, %s177_s29  ;;  %p183_p5 = scmp.lt.s32.totalorder %s177_s29, %s177_s29 }
   0xd   :  { %p184_p6 = por %p183_p5, %p182_p4 }
   0xf   :  { %p185_p7 = pnand %p184_p6, %p178_p3 }
  0x11   :  { %188 = shalt.err (!%p185_p7)
}
  0x12   :  { %23 = dma.hbm_to_vmem [thread:$0]  %s321_s0, 128, %s21_s19, [#allocation5]  }
  0x13   :  { %s189_s9 = scalar_lea.hbm %s322_s1, 128 }
  0x14   :  { %p190_p8 = scmp.ne.s32.totalorder %s322_s1, %s189_s9  ;;  %p193_p9 = scmp.lt.u32.totalorder %s189_s9, %s322_s1 }
  0x16   :  { %p195_p10 = pnand %p193_p9, %p190_p8 }
  0x18   :  { %198 = shalt.err (!%p195_p10)
}
  0x19   :  { %s199_s14 = scalar_lea.vmem %s31_s21, 128  ;;  %p204_p12 = scmp.lt.s32.totalorder %s31_s21, %s31_s21 }
  0x1a   :  { %p200_p11 = scmp.ne.s32.totalorder %s31_s21, %s199_s14  ;;  %p205_p13 = scmp.lt.s32.totalorder %s199_s14, %s199_s14 }
  0x1c   :  { %p206_p0 = por %p205_p13, %p204_p12 }
  0x1e   :  { %p207_p1 = pnand %p206_p0, %p200_p11 }
  0x20   :  { %210 = shalt.err (!%p207_p1)
}
  0x21   :  { %33 = dma.hbm_to_vmem [thread:$0]  %s322_s1, 128, %s31_s21, [#allocation8]  }
  0x22   :  { %233 = dma.done.wait [#allocation5], 128  }
  0x23   :  { %234 = vsyncadd [#allocation5], 4294967168 }
  0x24   :  { %235 = dma.done.wait [#allocation8], 128  }
  0x25   :  { %236 = vsyncadd [#allocation8], 4294967168  ;;  %v150_v0 = vld [vmem:[%s324_s3] ss:$0 sm:$0xff]  ;;  %vm62_vm0 = vcmask 261120   ;;  %v77_v2 = vld [vmem:[#allocation7] sm:$0xff]  ;;  %v66_v11 = vstv %s325_s4 }
  0x26   :  { %v94_v1 = vld [vmem:[%s323_s2] sm:$0xff]  ;;  %v78_v4 = vmul.f32 %v150_v0, %v77_v2  ;;  %vm50_vm1 = vcmask 0   ;;  %v241_v10 = vmov 0.0   ;;  %s242_s2 = smov [#allocation9]  }
  0x27   :  { %v95_v3 = vmul.f32 %v150_v0, %v94_v1  ;;  %v54_v5 = vld [vmem:[#allocation4] sm:$0xff]  ;;  %51 = vst.msk [vmem:[#allocation2] sm:$0x1] %vm50_vm1, %v241_v10  ;;  %s140_s4 = sshll.u32 %s242_s2, 4  ;;  %s141_s4 = int_to_ptr.vmem [resolvable:$true] %s140_s4 }
  0x28   :  { %v61_v6 = vmul.f32 %v150_v0, %v54_v5  ;;  %v79_v8 = vsel %vm62_vm0, %v78_v4, 0.0  ;;  %s211_s20 = scalar_lea.vmem %s141_s4, 16  ;;  %s215_s21 = scalar_lea.vmem %s141_s4, 32 }
  0x29   :  { %v96_v7 = vsel %vm62_vm0, %v95_v3, 0.0  ;;  %80 = vadd.xlane.f32.xlu0 %v79_v8  ;;  %p212_p2 = scmp.ne.s32.totalorder %s141_s4, %s211_s20  ;;  %p216_p3 = scmp.lt.s32.totalorder %s141_s4, %s141_s4 }
  0x2a   :  { %97 = vadd.xlane.f32.xlu1 %v96_v7  ;;  %v63_v9 = vsel %vm62_vm0, %v61_v6, 0.0  ;;  %p217_p4 = scmp.lt.s32.totalorder %s215_s21, %s211_s20 }
  0x2c   :  { %p218_p5 = por %p217_p4, %p216_p3 }
  0x2d   :  { %64 = vadd.xlane.f32.xlu0 %v63_v9 }
  0x2e   :  { %v117_v54 = vld [vmem:[#allocation2] sm:$0x1]  ;;  %p219_p6 = pnand %p218_p5, %p212_p2 }
  0xb6   :  { %v81_v13 = vpop.xlane.xlu0 %80 }
  0xb7   :  { %v98_v12 = vpop.xlane.xlu1 %97  ;;  %v82_v15 = vadd.f32 %v81_v13, %v66_v11 }
  0xb8   :  { %v99_v14 = vadd.f32 %v98_v12, %v66_v11 }
  0xb9   :  { %v83_v17 = vsub.f32 0.0, %v82_v15 }
  0xba   :  { %v100_v16 = vsub.f32 0.0, %v99_v14  ;;  %v65_v18 = vpop.xlane.xlu0 %64 }
  0xbb   :  { %v85_v20 = vand.u32 2147483647, %v83_v17  ;;  %v67_v21 = vadd.f32 %v66_v11, %v65_v18  ;;  %v84_v40 = vmax.f32 %v83_v17, 0.0 }
  0xbc   :  { %v102_v19 = vand.u32 2147483647, %v100_v16  ;;  %v101_v43 = vmax.f32 %v100_v16, 0.0 }
  0xbd   :  { %v86_v23 = vsub.f32 0.0, %v85_v20  ;;  %v69_v24 = vand.u32 2147483647, %v67_v21  ;;  %v68_v41 = vmax.f32 %v67_v21, 0.0 }
  0xbe   :  { %v103_v22 = vsub.f32 0.0, %v102_v19 }
  0xbf   :  { %v87_v26 = vmul.f32 1.442695, %v86_v23  ;;  %v70_v27 = vsub.f32 0.0, %v69_v24 }
  0xc0   :  { %v104_v25 = vmul.f32 1.442695, %v103_v22 }
  0xc1   :  { %v71_v28 = vmul.f32 1.442695, %v70_v27 }
  0xc2   :  { %155 = vpow2.f32 %v104_v25 }
  0xc3   :  { %157 = vpow2.f32 %v87_v26 }
  0xc4   :  { %159 = vpow2.f32 %v71_v28 }
  0xcc   :  { %v156_v29 = vpop.eup %155 }
  0xcd   :  { %v158_v30 = vpop.eup %157  ;;  %v106_v31 = vadd.f32 1.0, %v156_v29 }
  0xce   :  { %v89_v32 = vadd.f32 1.0, %v158_v30  ;;  %v160_v33 = vpop.eup %159 }
  0xcf   :  { %161 = vlog2.f32 %v106_v31  ;;  %v73_v34 = vadd.f32 1.0, %v160_v33 }
  0xd0   :  { %163 = vlog2.f32 %v89_v32 }
  0xd1   :  { %165 = vlog2.f32 %v73_v34 }
  0xd9   :  { %v162_v35 = vpop.eup %161 }
  0xda   :  { %v164_v36 = vpop.eup %163  ;;  %v108_v39 = vmul.f32 0.6931472, %v162_v35 }
  0xdb   :  { %v91_v37 = vmul.f32 0.6931472, %v164_v36  ;;  %v166_v38 = vpop.eup %165 }
  0xdc   :  { %v75_v42 = vmul.f32 0.6931472, %v166_v38  ;;  %v109_v46 = vadd.f32 %v108_v39, %v101_v43 }
  0xdd   :  { %v92_v44 = vadd.f32 %v91_v37, %v84_v40 }
  0xde   :  { %v76_v45 = vadd.f32 %v75_v42, %v68_v41 }
  0xe0   :  { %v93_v47 = vadd.f32 %v92_v44, %v76_v45 }
  0xe2   :  { %v110_v48 = vadd.f32 %v109_v46, %v93_v47 }
  0xe4   :  { %v119_v49 = vrot.slane %v110_v48, 4 }
  0xe6   :  { %v120_v50 = vadd.f32 %v119_v49, %v110_v48 }
  0xe8   :  { %v121_v51 = vrot.slane %v120_v50, 2 }
  0xea   :  { %v122_v52 = vadd.f32 %v121_v51, %v120_v50 }
  0xec   :  { %v123_v53 = vrot.slane %v122_v52, 1 }
  0xee   :  { %v124_v55 = vadd.f32 %v123_v53, %v122_v52 }
  0xf0   :  { %v125_v56 = vadd.f32 %v124_v55, %v117_v54 }
  0xf2   :  { %127 = vst.msk [vmem:[#allocation2] sm:$0x1] %vm50_vm1, %v125_v56 }
  0xf9   :  { %v131_v57 = vld [vmem:[#allocation2] sm:$0x1] }
  0xfa   :  { %v132_v58 = vmul.f32 0.041666668, %v131_v57 }
  0xfc   :  { %133 = vst.msk [vmem:[#allocation9] sm:$0x1] %vm50_vm1, %v132_v58 }
  0xfd   :  { %222 = shalt.err (!%p219_p6)
}
  0xfe   :  { %s223_s24 = scalar_lea.hbm %s326_s5, 16 }
  0xff   :  { %p224_p7 = scmp.ne.s32.totalorder %s326_s5, %s223_s24  ;;  %p227_p8 = scmp.lt.u32.totalorder %s223_s24, %s326_s5 }
 0x101   :  { %p229_p9 = pnand %p227_p8, %p224_p7 }
 0x103   :  { %232 = shalt.err (!%p229_p9)
}
 0x104   :  { %143 = dma.vmem_to_hbm [thread:$0]  %s141_s4, 16, %s326_s5, [#allocation6]  }
 0x105   :  { %237 = dma.done.wait [#allocation6], 16  }
 0x106   :  { %238 = vsyncadd [#allocation6], 4294967280 }
 0x107   :  { %147 = vsyncpa [#allocation5], 1 }
 0x108   :  { %148 = vsyncpa [#allocation8], 1 }
 0x109   :  { %149 = vsyncpa [#allocation6], 1 }

</bundles_post_ra>
